<compile_context>
chip_gen: v7x
topology: tpu7x:2x2x1
jax: 0.10.0
libtpu: 0.0.40
codegen_flags: <defaults>
</compile_context>

<pallas_src>
import functools

import jax
import jax.numpy as jnp
from jax import lax
from jax.experimental import pallas as pl
from jax.experimental.pallas import tpu as pltpu


_TRANSCENDENTAL_ACTS = ("sigmoid", "tanh", "ELU", "SELU", "GELU", "Softplus", "Swish")


def _activation(h, name: str):
    """Static (trace-time) selection matching SimpleNN.forward branches."""
    if name == "sigmoid":
        return jax.nn.sigmoid(h)
    elif name == "tanh":
        return jnp.tanh(h)
    elif name == "ReLU":
        return jnp.maximum(h, 0.0)
    elif name == "leaky_ReLU":
        return jnp.where(h >= 0.0, h, 0.01 * h)
    elif name == "ELU":
        # NOTE: expm1 is evaluated on both branches of the select; for large
        # positive h the unselected branch is +inf but never NaN, and select
        # discards it.  Do not rewrite as a multiply-by-mask form.
        return jnp.where(h >= 0.0, h, jnp.expm1(h))           # alpha = 1.0
    elif name == "SELU":
        alpha = 1.6732632423543772848170429916717
        scale = 1.0507009873554804934193349852946
        return scale * jnp.where(h >= 0.0, h, alpha * jnp.expm1(h))
    elif name == "GELU":
        # F.gelu default = exact (erf-based) GELU
        return 0.5 * h * (1.0 + lax.erf(h / jnp.sqrt(2.0).astype(h.dtype)))
    elif name == "Softplus":
        return jax.nn.softplus(h)
    elif name == "Swish":
        return h * jax.nn.sigmoid(h)
    else:
        # No matching branch in the PyTorch forward -> no activation applied.
        return h


def _round_up(n, m):
    return ((n + m - 1) // m) * m


def _cdiv(a, b):
    return -(-a // b)


def simple_nn_kernel(x_ref, w1_ref, b1_ref, w2_ref, b2_ref, w3_ref, b3_ref,
                     out_ref, *, activation: str, compute_dtype):
    # x tile arrives in its original dtype; cast in-kernel (VPU, cheap) so the
    # wrapper never does a separate HBM cast pass.
    x = x_ref[...].astype(compute_dtype)

    # Layer 1, feature-major: (hid, in) x (TB, in) contracted on `in`
    # -> (hid, TB).  Batch lives on the lane axis from here on.
    h1 = lax.dot_general(w1_ref[...], x,
                         dimension_numbers=(((1,), (1,)), ((), ())),
                         preferred_element_type=jnp.float32)
    h1 = _activation(h1 + b1_ref[...], activation)          # f32 on VPU/EUP

    # Layer 2: (hid, hid) @ (hid, TB) -> (hid, TB).  bf16 MXU operands,
    # f32 accumulation.
    h2 = jnp.dot(w2_ref[...], h1.astype(compute_dtype),
                 preferred_element_type=jnp.float32)
    h2 = _activation(h2 + b2_ref[...], activation)

    # Layer 3: (out, hid) @ (hid, TB) -> (out, TB), lane-dense store in batch.
    h3 = jnp.dot(w3_ref[...], h2.astype(compute_dtype),
                 preferred_element_type=jnp.float32)
    out_ref[...] = (h3 + b3_ref[...]).astype(out_ref.dtype)


def simple_nn_forward(x, params, activation: str = "tanh", *,
                      compute_dtype=jnp.bfloat16, batch_tile: int = 4096):
    """x: (B, input_size). params: PyTorch-convention weights (out, in) / (out,)."""
    w1, b1 = params["w1"], params["b1"]   # (hidden, input), (hidden,)
    w2, b2 = params["w2"], params["b2"]   # (hidden, hidden), (hidden,)
    w3, b3 = params["w3"], params["b3"]   # (output, hidden), (output,)

    hidden_size, input_size = w1.shape
    out_size = w3.shape[0]
    B = x.shape[0]

    # Layout prep (tiny, one-time): weights kept in PyTorch (out, in) layout
    # (feature-major kernel needs no transposes), biases as f32 columns that
    # broadcast over the lane (batch) axis.
    w1c = w1.astype(compute_dtype)
    w2c = w2.astype(compute_dtype)
    w3c = w3.astype(compute_dtype)
    b1c = b1[:, None].astype(jnp.float32)     # (hidden, 1)
    b2c = b2[:, None].astype(jnp.float32)     # (hidden, 1)
    b3c = b3[:, None].astype(jnp.float32)     # (out, 1)

    # Batch-tile selection:
    #  * tiny B: one exact block covering the whole batch (block dims equal the
    #    full array dims, so no (8,128) padding/ragged handling needed at all);
    #  * otherwise: large lane-aligned tile, capped at ceil(B/2) rounded to 128
    #    so there are always >=2 grid steps (keeps both v7x TensorCores busy).
    if B <= 256:
        TB = B
    else:
        TB = max(128, min(int(batch_tile), _round_up(_cdiv(B, 2), 128)))
    grid = (_cdiv(B, TB),)

    kernel = functools.partial(simple_nn_kernel, activation=activation,
                               compute_dtype=compute_dtype)

    flops = 2 * B * (input_size * hidden_size
                     + hidden_size * hidden_size
                     + hidden_size * out_size)
    transcendentals = 2 * B * hidden_size if activation in _TRANSCENDENTAL_ACTS else 0
    bytes_accessed = (x.size * x.dtype.itemsize
                      + B * out_size * 4
                      + sum(a.size * a.dtype.itemsize
                            for a in (w1c, w2c, w3c, b1c, b2c, b3c)))

    # Weights/biases: constant index_map -> VMEM-resident across the whole grid.
    resident = lambda a: pl.BlockSpec(a.shape, lambda i: (0, 0))

    out_t = pl.pallas_call(
        kernel,
        out_shape=jax.ShapeDtypeStruct((out_size, B), jnp.float32),
        grid=grid,
        in_specs=[pl.BlockSpec((TB, input_size), lambda i: (i, 0)),
                  resident(w1c), resident(b1c),
                  resident(w2c), resident(b2c),
                  resident(w3c), resident(b3c)],
        out_specs=pl.BlockSpec((out_size, TB), lambda i: (0, i)),
        compiler_params=pltpu.CompilerParams(
            dimension_semantics=("parallel",)),
        cost_estimate=pl.CostEstimate(flops=flops,
                                      transcendentals=transcendentals,
                                      bytes_accessed=bytes_accessed),
    )(x, w1c, b1c, w2c, b2c, w3c, b3c)

    # Back to the PyTorch (B, out_size) layout without an XLA transpose when
    # out_size == 1 (pure reshape).
    if out_size == 1:
        return out_t.reshape(B)[:, None]
    return out_t.T


def _reference(x, params, activation):
    h = _activation(x @ params["w1"].T + params["b1"], activation)
    h = _activation(h @ params["w2"].T + params["b2"], activation)
    return h @ params["w3"].T + params["b3"]


if __name__ == "__main__":
    # Small shapes consistent with the module: a flat feature-vector MLP.
    batch, input_size, hidden_size, output_size = 8, 16, 32, 1
    activation = "tanh"   # Hyperparameters.reward_model_activation_function

    key = jax.random.PRNGKey(0)
    kx, k1, k2, k3, kb1, kb2, kb3 = jax.random.split(key, 7)

    x = jax.random.normal(kx, (batch, input_size), dtype=jnp.float32)

    # Deterministic synthetic parameters (PyTorch Linear convention: (out, in)).
    params = {
        "w1": 0.1 * jax.random.normal(k1, (hidden_size, input_size), jnp.float32),
        "b1": 0.1 * jax.random.normal(kb1, (hidden_size,), jnp.float32),
        "w2": 0.1 * jax.random.normal(k2, (hidden_size, hidden_size), jnp.float32),
        "b2": 0.1 * jax.random.normal(kb2, (hidden_size,), jnp.float32),
        "w3": 0.1 * jax.random.normal(k3, (output_size, hidden_size), jnp.float32),
        "b3": 0.1 * jax.random.normal(kb3, (output_size,), jnp.float32),
    }

    ref = _reference(x, params, activation)

    # Full-precision path: exact semantics check.
    out_f32 = simple_nn_forward(x, params, activation=activation,
                                compute_dtype=jnp.float32)
    out_f32 = jax.block_until_ready(out_f32)
    assert out_f32.shape == (batch, output_size)
    assert jnp.allclose(out_f32, ref, atol=1e-4, rtol=1e-4), "f32 mismatch vs JAX reference"

    # Default path (bf16 weights + bf16 MXU operands, f32 accumulation):
    # tolerance set for bf16 rounding of weights and intermediates.
    out_bf16 = simple_nn_forward(x, params, activation=activation)
    out_bf16 = jax.block_until_ready(out_bf16)
    assert out_bf16.shape == (batch, output_size)
    assert jnp.allclose(out_bf16, ref, atol=5e-2, rtol=5e-2), "bf16 mismatch vs JAX reference"

    print("KERNEL_OK")
</pallas_src>

<mosaic_0001>
module attributes {stable_mosaic.version = 11 : i64} {
  func.func @simple_nn_kernel(%arg0: i32, %arg1: memref<8x16xf32, #tpu.memory_space<vmem>>, %arg2: memref<32x16xf32, #tpu.memory_space<vmem>>, %arg3: memref<32x1xf32, #tpu.memory_space<vmem>>, %arg4: memref<32x32xf32, #tpu.memory_space<vmem>>, %arg5: memref<32x1xf32, #tpu.memory_space<vmem>>, %arg6: memref<1x32xf32, #tpu.memory_space<vmem>>, %arg7: memref<1x1xf32, #tpu.memory_space<vmem>>, %arg8: memref<1x8xf32, #tpu.memory_space<vmem>>) attributes {dimension_semantics = [#tpu.dimension_semantics<parallel>], iteration_bounds = array<i64: 1>, scalar_prefetch = 0 : i64, scratch_operands = 0 : i64, tpu.core_type = #tpu.core_type<tc>, window_params = [{transform_indices = @transform_0, window_bounds = array<i64: 8, 16>}, {pipeline_mode = #tpu.pipeline_mode<synchronous>, transform_indices = @transform_1, window_bounds = array<i64: 32, 16>}, {pipeline_mode = #tpu.pipeline_mode<synchronous>, transform_indices = @transform_2, window_bounds = array<i64: 32, 1>}, {pipeline_mode = #tpu.pipeline_mode<synchronous>, transform_indices = @transform_3, window_bounds = array<i64: 32, 32>}, {pipeline_mode = #tpu.pipeline_mode<synchronous>, transform_indices = @transform_4, window_bounds = array<i64: 32, 1>}, {pipeline_mode = #tpu.pipeline_mode<synchronous>, transform_indices = @transform_5, window_bounds = array<i64: 1, 32>}, {pipeline_mode = #tpu.pipeline_mode<synchronous>, transform_indices = @transform_6, window_bounds = array<i64: 1, 1>}, {transform_indices = @transform_7, window_bounds = array<i64: 1, 8>}]} {
    %c0 = arith.constant 0 : index
    %c0_0 = arith.constant 0 : index
    %0 = vector.load %arg1[%c0, %c0_0] : memref<8x16xf32, #tpu.memory_space<vmem>>, vector<8x16xf32>
    %c0_1 = arith.constant 0 : index
    %c0_2 = arith.constant 0 : index
    %1 = vector.load %arg2[%c0_1, %c0_2] : memref<32x16xf32, #tpu.memory_space<vmem>>, vector<32x16xf32>
    %cst = arith.constant dense<0.000000e+00> : vector<32x8xf32>
    %2 = tpu.matmul %1, %0, %cst {dimension_numbers = #tpu.dot_dimension_numbers<[1], [1], [0], [0], [0, 0, 1, 0], [], []>} : vector<32x16xf32>, vector<8x16xf32>, vector<32x8xf32> -> vector<32x8xf32>
    %c0_3 = arith.constant 0 : index
    %c0_4 = arith.constant 0 : index
    %3 = vector.load %arg3[%c0_3, %c0_4] : memref<32x1xf32, #tpu.memory_space<vmem>>, vector<32x1xf32>
    %4 = vector.broadcast %3 : vector<32x1xf32> to vector<32x8xf32>
    %5 = arith.addf %2, %4 : vector<32x8xf32>
    %6 = math.tanh %5 : vector<32x8xf32>
    %c0_5 = arith.constant 0 : index
    %c0_6 = arith.constant 0 : index
    %7 = vector.load %arg4[%c0_5, %c0_6] : memref<32x32xf32, #tpu.memory_space<vmem>>, vector<32x32xf32>
    %cst_7 = arith.constant dense<0.000000e+00> : vector<32x8xf32>
    %8 = tpu.matmul %7, %6, %cst_7 {dimension_numbers = #tpu.dot_dimension_numbers<[1], [0], [0], [1], [0, 0, 1, 1], [], []>} : vector<32x32xf32>, vector<32x8xf32>, vector<32x8xf32> -> vector<32x8xf32>
    %c0_8 = arith.constant 0 : index
    %c0_9 = arith.constant 0 : index
    %9 = vector.load %arg5[%c0_8, %c0_9] : memref<32x1xf32, #tpu.memory_space<vmem>>, vector<32x1xf32>
    %10 = vector.broadcast %9 : vector<32x1xf32> to vector<32x8xf32>
    %11 = arith.addf %8, %10 : vector<32x8xf32>
    %12 = math.tanh %11 : vector<32x8xf32>
    %c0_10 = arith.constant 0 : index
    %c0_11 = arith.constant 0 : index
    %13 = vector.load %arg6[%c0_10, %c0_11] : memref<1x32xf32, #tpu.memory_space<vmem>>, vector<1x32xf32>
    %cst_12 = arith.constant dense<0.000000e+00> : vector<1x8xf32>
    %14 = tpu.matmul %13, %12, %cst_12 {dimension_numbers = #tpu.dot_dimension_numbers<[1], [0], [0], [1], [0, 0, 1, 1], [], []>} : vector<1x32xf32>, vector<32x8xf32>, vector<1x8xf32> -> vector<1x8xf32>
    %c0_13 = arith.constant 0 : index
    %c0_14 = arith.constant 0 : index
    %15 = vector.load %arg7[%c0_13, %c0_14] : memref<1x1xf32, #tpu.memory_space<vmem>>, vector<1x1xf32>
    %16 = vector.broadcast %15 : vector<1x1xf32> to vector<1x8xf32>
    %17 = arith.addf %14, %16 : vector<1x8xf32>
    %c0_15 = arith.constant 0 : index
    %c0_16 = arith.constant 0 : index
    %18 = vector.load %arg8[%c0_15, %c0_16] : memref<1x8xf32, #tpu.memory_space<vmem>>, vector<1x8xf32>
    tpu.vector_store %arg8[%c0_15, %c0_16], %17 {strides = array<i32>} : memref<1x8xf32, #tpu.memory_space<vmem>>, vector<1x8xf32>,
    return
  }
  func.func @transform_0(%arg0: i32) -> (i32, i32) {
    %c0_i32 = arith.constant 0 : i32
    %c0_i32_0 = arith.constant 0 : i32
    return %arg0, %c0_i32 : i32, i32
  }
  func.func @transform_1(%arg0: i32) -> (i32, i32) {
    %c0_i32 = arith.constant 0 : i32
    %c0_i32_0 = arith.constant 0 : i32
    %c0_i32_1 = arith.constant 0 : i32
    return %c0_i32, %c0_i32_0 : i32, i32
  }
  func.func @transform_2(%arg0: i32) -> (i32, i32) {
    %c0_i32 = arith.constant 0 : i32
    %c0_i32_0 = arith.constant 0 : i32
    %c0_i32_1 = arith.constant 0 : i32
    return %c0_i32, %c0_i32_0 : i32, i32
  }
  func.func @transform_3(%arg0: i32) -> (i32, i32) {
    %c0_i32 = arith.constant 0 : i32
    %c0_i32_0 = arith.constant 0 : i32
    %c0_i32_1 = arith.constant 0 : i32
    return %c0_i32, %c0_i32_0 : i32, i32
  }
  func.func @transform_4(%arg0: i32) -> (i32, i32) {
    %c0_i32 = arith.constant 0 : i32
    %c0_i32_0 = arith.constant 0 : i32
    %c0_i32_1 = arith.constant 0 : i32
    return %c0_i32, %c0_i32_0 : i32, i32
  }
  func.func @transform_5(%arg0: i32) -> (i32, i32) {
    %c0_i32 = arith.constant 0 : i32
    %c0_i32_0 = arith.constant 0 : i32
    %c0_i32_1 = arith.constant 0 : i32
    return %c0_i32, %c0_i32_0 : i32, i32
  }
  func.func @transform_6(%arg0: i32) -> (i32, i32) {
    %c0_i32 = arith.constant 0 : i32
    %c0_i32_0 = arith.constant 0 : i32
    %c0_i32_1 = arith.constant 0 : i32
    return %c0_i32, %c0_i32_0 : i32, i32
  }
  func.func @transform_7(%arg0: i32) -> (i32, i32) {
    %c0_i32 = arith.constant 0 : i32
    %c0_i32_0 = arith.constant 0 : i32
    return %c0_i32, %arg0 : i32, i32
  }
}

</mosaic_0001>

<bundles_post_ra>
// kernel: tpu_custom_call.1
= control target key start
LH: loop header
LB: loop body
LE: loop exit
PB: predicated region body
PF: predicated region fallthrough
CT: control target
= control target key end

     0   :  { %s640_s0 = inlined_call_operand.vmem [shape: f32[8,16], index: 0, kind: input, shape index: {}]   ;;  %s641_s1 = inlined_call_operand.vmem [shape: f32[32,16], index: 1, kind: input, shape index: {}]   ;;  %s642_s2 = inlined_call_operand.vmem [shape: f32[32,1], index: 2, kind: input, shape index: {}]   ;;  %s643_s3 = inlined_call_operand.vmem [shape: f32[32,32], index: 3, kind: input, shape index: {}]   ;;  %s644_s4 = inlined_call_operand.vmem [shape: f32[32,1], index: 4, kind: input, shape index: {}]   ;;  %s645_s5 = inlined_call_operand.vmem [shape: f32[1,32], index: 5, kind: input, shape index: {}]   ;;  %s646_s6 = inlined_call_operand.<no memory space> [shape: f32[1,1], index: 6, kind: input, shape index: {}]   ;;  %s647_s7 = inlined_call_operand.hbm [shape: f32[1,8], index: 7, kind: output, shape index: {}]  }
   0x1   :  { %v12_v0 = vstv %s646_s6 }
   0x2   :  { %13 = vst [vmem:[#allocation2] sm:$0x1] %v12_v0 }
   0x3   :  { %v29_v1 = vld [vmem:[%s640_s0] sm:$0xff]  ;;  %vm58_vm0 = vcmask 130048   ;;  %v31_v4 = vld [vmem:[%s641_s1 + $0x8] sm:$0xff]  ;;  %v515_v5 = vmov 0   ;;  %v36_v6 = vld [vmem:[%s642_s2 + $0x10] sm:$0xff] }
   0x4   :  { %v30_v2 = vld [vmem:[%s641_s1] sm:$0xff]  ;;  %421 = vmatprep.subr.msk.mxu0 %vm58_vm0, %v29_v1  ;;  %473 = vset.pattern.permute.xlu0 %v515_v5  ;;  %v32_v7 = vld [vmem:[%s641_s1 + $0x10] sm:$0xff]  ;;  %v35_v8 = vld [vmem:[%s642_s2 + $0x8] sm:$0xff] }
   0x5   :  { %423 = vmatprep.mubr.msk.f32.mxu0 %vm58_vm0, %v30_v2  ;;  %v34_v3 = vld [vmem:[%s642_s2] sm:$0xff]  ;;  %422 = vmatpush3.xpose.msk.msra.mxu0 %vm58_vm0, %v29_v1 }
   0x6   :  { %40 = vperm.xlu0 %473, %v34_v3   ;;  %474 = vset.pattern.permute.xlu1 %v515_v5 }
   0x7   :  { %50 = vperm.xlu1 %474, %v36_v6  }
   0x8   :  { %14 = vsyncpa [#allocation4], 0  ;;  %424 = vmatmul.mubr.msk.f32.vlgmr.msra.gmra.mrb[0].mxu0 %vm58_vm0, %v31_v4  ;;  %v37_v9 = vld [vmem:[%s642_s2 + $0x18] sm:$0xff]  ;;  %v167_v11 = vld [vmem:[%s644_s4] sm:$0xff]  ;;  %vm191_vm1 = vcmask 261120   ;;  %v516_v38 = vmov 0.0|0.0   ;;  %v300_v59 = vlaneseq }
   0x9   :  { %426 = vmatprep.mubr.msk.f32.mxu0 %vm58_vm0, %v32_v7  ;;  %v33_v10 = vld [vmem:[%s641_s1 + $0x18] sm:$0xff]  ;;  %v168_v12 = vld [vmem:[%s644_s4 + $0x8] sm:$0xff]  ;;  %v169_v13 = vld [vmem:[%s644_s4 + $0x10] sm:$0xff]  ;;  %462 = vmatprep.subr.bf16.mxu0 %v516_v38  ;;  %vm517_vm2 = vmmov 0   ;;  %v518_v39 = vmov 0.0   ;;  %s519_s9 = smov [#allocation3]  }
   0xa   :  { %45 = vperm.xlu0 %473, %v35_v8   ;;  %v170_v14 = vld [vmem:[%s644_s4 + $0x18] sm:$0xff]  ;;  %v294_v15 = vld [vmem:[#allocation2] sm:$0x1]  ;;  %v164_v35 = vld [vmem:[%s643_s3 + $0x8] sm:$0xff]  ;;  %v301_v60 = vshrl.u32 %v300_v59, 7  ;;  %s385_s0 = sshll.u32 %s519_s9, 4  ;;  %s386_s0 = int_to_ptr.vmem [resolvable:$true] %s385_s0 }
   0xb   :  { %55 = vperm.xlu1 %474, %v37_v9   ;;  %v163_v16 = vld [vmem:[%s643_s3] sm:$0xff]  ;;  %v165_v36 = vld [vmem:[%s643_s3 + $0x10] sm:$0xff]  ;;  %v166_v37 = vld [vmem:[%s643_s3 + $0x18] sm:$0xff]  ;;  %vm377_vm3 = vcmask 57344   ;;  %s491_s10 = scalar_lea.vmem %s386_s0, 16  ;;  %s495_s11 = scalar_lea.vmem %s386_s0, 32 }
   0xc   :  { %427 = vmatmul.mubr.msk.f32.gmra.mrb[2].mxu0 %vm58_vm0, %v33_v10  ;;  %437 = vmatprep.mubr.msk.f32.mxu1 %vm191_vm1, %v163_v16  ;;  %v293_v58 = vld [vmem:[%s645_s5] sm:$0x1]  ;;  %v302_v61 = vsub.s32 0, %v301_v60  ;;  %p492_p0 = scmp.ne.s32.totalorder %s386_s0, %s491_s10  ;;  %p496_p1 = scmp.lt.s32.totalorder %s386_s0, %s386_s0 }
   0xd   :  { %451 = vmatprep.mubr.msk.f32.mxu0 %vm517_vm2, %v518_v39  ;;  %p497_p2 = scmp.lt.s32.totalorder %s495_s11, %s491_s10 }
   0xe   :  { %173 = vperm.xlu0 %473, %v167_v11  }
   0xf   :  { %178 = vperm.xlu1 %474, %v168_v12   ;;  %p498_p3 = por %p497_p2, %p496_p1 }
  0x11   :  { %p499_p4 = pnand %p498_p3, %p492_p0 }
  0x12   :  { %183 = vperm.xlu0 %473, %v169_v13  }
  0x13   :  { %188 = vperm.xlu1 %474, %v170_v14  }
  0x16   :  { %297 = vperm.xlu0 %473, %v294_v15  }
  0x85   :  { %v41_v17 = vpop.permute.xlu0 %40 }
  0x86   :  { %v51_v18 = vpop.permute.xlu1 %50 }
  0x89   :  { %v46_v19 = vpop.permute.xlu0 %45 }
  0x8a   :  { %v56_v24 = vpop.permute.xlu1 %55 }
  0x8d   :  { %v174_v41 = vpop.permute.xlu0 %173 }
  0x8e   :  { %v179_v40 = vpop.permute.xlu1 %178 }
  0x91   :  { %v184_v48 = vpop.permute.xlu0 %183 }
  0x92   :  { %v189_v46 = vpop.permute.xlu1 %188 }
  0x95   :  { %v298_v62 = vpop.permute.xlu0 %297 }
  0x96   :  { %v303_v63 = vrot.slane %v298_v62, %v302_v61 }
  0xdb   :  { %v425_v20 = vpop.f32.mrb[0].mxu0 }
  0xdc   :  { %v146_v21 = vadd.f32 %v425_v20, %v46_v19  ;;  %v140_v22 = vpop.f32.mrb[1].mxu0 }
  0xdd   :  { %v141_v23 = vadd.f32 %v140_v22, %v41_v17 }
  0xde   :  { %475 = vtanh.f32 %v146_v21 }
  0xdf   :  { %477 = vtanh.f32 %v141_v23  ;;  %v428_v25 = vpop.f32.mrb[2].mxu0 }
  0xe0   :  { %v156_v26 = vadd.f32 %v428_v25, %v56_v24  ;;  %v150_v27 = vpop.f32.mrb[3].mxu0 }
  0xe1   :  { %v151_v28 = vadd.f32 %v150_v27, %v51_v18 }
  0xe2   :  { %479 = vtanh.f32 %v156_v26 }
  0xe3   :  { %481 = vtanh.f32 %v151_v28 }
  0xe8   :  { %v476_v29 = vpop.eup %475 }
  0xe9   :  { %v478_v30 = vpop.eup %477 }
  0xea   :  { %v454_v31 = vpack.c.bf16 %v476_v29, %v478_v30 }
  0xec   :  { %v480_v32 = vpop.eup %479  ;;  %455 = vmatprep.subr.bf16.mxu1 %v454_v31 }
  0xed   :  { %v482_v33 = vpop.eup %481  ;;  %457 = vmatpush3.bf16.msra.mxu1 %v454_v31 }
  0xee   :  { %v458_v34 = vpack.c.bf16 %v480_v32, %v482_v33 }
  0xf0   :  { %459 = vmatprep.subr.bf16.mxu1 %v458_v34 }
  0xf1   :  { %461 = vmatpush3.bf16.msra.mxu1 %v458_v34 }
  0xf4   :  { %438 = vmatmul.mubr.msk.f32.vlgmr.msra.gmra.mrb[0].mxu1 %vm191_vm1, %v164_v35 }
  0xf5   :  { %440 = vmatprep.mubr.msk.f32.mxu1 %vm191_vm1, %v165_v36 }
  0xf8   :  { %441 = vmatmul.mubr.msk.f32.gmra.mrb[2].mxu1 %vm191_vm1, %v166_v37 }
 0x1c7   :  { %v439_v42 = vpop.f32.mrb[0].mxu1 }
 0x1c8   :  { %v276_v43 = vadd.f32 %v439_v42, %v179_v40  ;;  %v270_v44 = vpop.f32.mrb[1].mxu1 }
 0x1c9   :  { %v271_v45 = vadd.f32 %v270_v44, %v174_v41 }
 0x1ca   :  { %483 = vtanh.f32 %v276_v43 }
 0x1cb   :  { %485 = vtanh.f32 %v271_v45  ;;  %v442_v47 = vpop.f32.mrb[2].mxu1 }
 0x1cc   :  { %v286_v49 = vadd.f32 %v442_v47, %v189_v46  ;;  %v280_v50 = vpop.f32.mrb[3].mxu1 }
 0x1cd   :  { %v281_v51 = vadd.f32 %v280_v50, %v184_v48 }
 0x1ce   :  { %487 = vtanh.f32 %v286_v49 }
 0x1cf   :  { %489 = vtanh.f32 %v281_v51 }
 0x1d4   :  { %v484_v52 = vpop.eup %483 }
 0x1d5   :  { %v486_v53 = vpop.eup %485 }
 0x1d6   :  { %v463_v54 = vpack.c.bf16 %v484_v52, %v486_v53 }
 0x1d8   :  { %v488_v55 = vpop.eup %487  ;;  %464 = vmatpush3.bf16.msra.mxu0 %v463_v54 }
 0x1d9   :  { %v490_v56 = vpop.eup %489  ;;  %465 = vmatprep.subr.bf16.mxu0 %v516_v38 }
 0x1da   :  { %v466_v57 = vpack.c.bf16 %v488_v55, %v490_v56 }
 0x1dc   :  { %467 = vmatpush3.bf16.msra.mxu0 %v466_v57 }
 0x1df   :  { %452 = vmatmul.mubr.msk.f32.vlgmr.msra.gmra.mrb[4].mxu0 %vm191_vm1, %v293_v58 }
 0x2b2   :  { %v373_v0 = vpop.f32.mrb[4].mxu0 }
 0x2b3   :  { %v374_v1 = vadd.f32 %v373_v0, %v303_v63  ;;  %v453_v2 = vpop.f32.mrb[5].mxu0 }
 0x2b5   :  { %378 = vst.msk [vmem:[#allocation3] sm:$0x1] %vm377_vm3, %v374_v1 }
 0x2b6   :  { %502 = shalt.err (!%p499_p4)
}
 0x2b7   :  { %s503_s13 = scalar_lea.hbm %s647_s7, 16 }
 0x2b8   :  { %p504_p5 = scmp.ne.s32.totalorder %s647_s7, %s503_s13  ;;  %p507_p6 = scmp.lt.u32.totalorder %s503_s13, %s647_s7 }
 0x2ba   :  { %p509_p7 = pnand %p507_p6, %p504_p5 }
 0x2bc   :  { %512 = shalt.err (!%p509_p7)
}
 0x2bd   :  { %388 = dma.vmem_to_hbm [thread:$0]  %s386_s0, 16, %s647_s7, [#allocation4]  }
 0x2be   :  { %513 = dma.done.wait [#allocation4], 16  }
 0x2bf   :  { %514 = vsyncadd [#allocation4], 4294967280 }
 0x2c0   :  { %392 = vsyncpa [#allocation4], 1 }

</bundles_post_ra>
